<compile_context>
chip_gen: v5e
topology: v5e:2x2
jax: 0.10.0
libtpu: 0.0.40
codegen_flags: <defaults>
</compile_context>

<pallas_src>
import functools

import jax
import jax.numpy as jnp
import numpy as np
from jax import lax
from jax.experimental import pallas as pl
from jax.experimental.pallas import tpu as pltpu


def convbn_kernel(w_ref, p_ref, g_ref, b_ref, out_ref, *, eps, inv_m):
    """Fused im2col-matmul conv + training-mode BatchNorm.

    w_ref  : (Cout, K)  bf16   conv weight,   K = KH*KW*Cin
    p_ref  : (K, M)     bf16   im2col patches, M = N*H*W (on lanes)
    g_ref  : (Cout, 1)  f32    BN gamma
    b_ref  : (Cout, 1)  f32    BN beta
    out_ref: (Cout, M)  f32    normalized conv output (lane-dense)
    """
    # Single MXU matmul: bf16 operands, f32 accumulation.
    acc = jnp.dot(w_ref[...], p_ref[...],
                  preferred_element_type=jnp.float32)          # (Cout, M) f32

    # One-pass batch statistics (biased variance), reductions along lanes.
    s = jnp.sum(acc, axis=1, keepdims=True)                    # (Cout, 1)
    ss = jnp.sum(acc * acc, axis=1, keepdims=True)             # (Cout, 1)
    mean = s * inv_m
    var = ss * inv_m - mean * mean
    scale = g_ref[...] * lax.rsqrt(var + eps)                  # (Cout, 1)
    shift = b_ref[...] - mean * scale                          # (Cout, 1)

    # Normalize and store (full-width, lane-dense store).
    out_ref[...] = (acc * scale + shift).astype(out_ref.dtype)


def _im2col_kcm(x_nchw, kh, kw, stride, pad):
    """Build the (K, M) = (KH*KW*Cin, N*Hout*Wout) patch matrix in bf16.

    K ordering: k = (i*KW + j)*Cin + ci ;  M ordering: m = (n*Hout + y)*Wout + x.
    """
    N, Cin, H, W = x_nchw.shape
    Hout = (H + 2 * pad - kh) // stride + 1
    Wout = (W + 2 * pad - kw) // stride + 1
    x = x_nchw.astype(jnp.bfloat16)
    xp = jnp.pad(x, ((0, 0), (0, 0), (pad, pad), (pad, pad)))
    taps = [
        xp[:, :,
           i:i + stride * (Hout - 1) + 1:stride,
           j:j + stride * (Wout - 1) + 1:stride]
        for i in range(kh) for j in range(kw)
    ]                                                  # each (N, Cin, Hout, Wout)
    pat = jnp.stack(taps, axis=0)                      # (T, N, Cin, Hout, Wout)
    pat = jnp.transpose(pat, (0, 2, 1, 3, 4))          # (T, Cin, N, Hout, Wout)
    return pat.reshape(kh * kw * Cin, N * Hout * Wout), Hout, Wout


def conv_bn(x_nchw, w_oihw, gamma, beta, *, stride=1, pad=1, eps=1e-5):
    """Forward pass of ConvBn (Conv2d bias=False + BatchNorm2d, training mode).

    x_nchw: (N, Cin, H, W)   w_oihw: (Cout, Cin, KH, KW)
    returns (N, Cout, Hout, Wout), same semantics as bn(conv(x)).
    """
    N, Cin, H, W = x_nchw.shape
    Cout, _, KH, KW = w_oihw.shape

    patches, Hout, Wout = _im2col_kcm(x_nchw, KH, KW, stride, pad)
    M = N * Hout * Wout

    # (Cout, K) with k = (i*KW + j)*Cin + ci, matching the patch ordering.
    w_mat = jnp.transpose(w_oihw, (0, 2, 3, 1)).reshape(Cout, KH * KW * Cin)
    w_mat = w_mat.astype(jnp.bfloat16)

    out_cm = pl.pallas_call(
        functools.partial(convbn_kernel, eps=float(eps), inv_m=1.0 / float(M)),
        out_shape=jax.ShapeDtypeStruct((Cout, M), jnp.float32),
        in_specs=[pl.BlockSpec(memory_space=pltpu.MemorySpace.VMEM)] * 4,
        out_specs=pl.BlockSpec(memory_space=pltpu.MemorySpace.VMEM),
    )(w_mat, patches,
      gamma.reshape(Cout, 1).astype(jnp.float32),
      beta.reshape(Cout, 1).astype(jnp.float32))

    # Back to the PyTorch NCHW contract (single small layout pass).
    return jnp.transpose(out_cm.reshape(Cout, N, Hout, Wout), (1, 0, 2, 3))


def conv_bn_reference(x_nchw, w_oihw, gamma, beta, eps=1e-5):
    """Plain-JAX reference: lax conv + training-mode BN (biased variance).

    Conv operands are cast to bf16 with f32 accumulation, mirroring the
    kernel's MXU path, so the comparison isolates accumulation-order noise.
    """
    y = lax.conv_general_dilated(
        x_nchw.astype(jnp.bfloat16), w_oihw.astype(jnp.bfloat16),
        window_strides=(1, 1), padding=((1, 1), (1, 1)),
        dimension_numbers=("NCHW", "OIHW", "NCHW"),
        preferred_element_type=jnp.float32)
    mean = jnp.mean(y, axis=(0, 2, 3), keepdims=True)
    var = jnp.mean((y - mean) ** 2, axis=(0, 2, 3), keepdims=True)
    g = gamma.reshape(1, -1, 1, 1)
    b = beta.reshape(1, -1, 1, 1)
    return (y - mean) * lax.rsqrt(var + eps) * g + b


if __name__ == "__main__":
    key = jax.random.PRNGKey(0)
    k_x, k_w, k_g, k_b = jax.random.split(key, 4)

    N, Cin, H, W = 2, 4, 16, 16
    Cout, KH, KW = 8, 3, 3

    x = jax.random.normal(k_x, (N, Cin, H, W), dtype=jnp.float32)
    # Deterministic synthetic params (shapes match nn.Conv2d / nn.BatchNorm2d).
    w = jax.random.normal(k_w, (Cout, Cin, KH, KW), dtype=jnp.float32) * 0.1
    gamma = 1.0 + 0.1 * jax.random.normal(k_g, (Cout,), dtype=jnp.float32)
    beta = 0.1 * jax.random.normal(k_b, (Cout,), dtype=jnp.float32)

    out = conv_bn(x, w, gamma, beta)
    out = jax.block_until_ready(out)

    ref = conv_bn_reference(x, w, gamma, beta)
    np.testing.assert_allclose(np.asarray(out), np.asarray(ref),
                               rtol=1e-3, atol=1e-3)

    print("KERNEL_OK")
</pallas_src>

<mosaic_0001>
module attributes {stable_mosaic.version = 11 : i64} {
  func.func @convbn_kernel(%arg0: memref<8x36xbf16, #tpu.memory_space<vmem>>, %arg1: memref<36x512xbf16, #tpu.memory_space<vmem>>, %arg2: memref<8x1xf32, #tpu.memory_space<vmem>>, %arg3: memref<8x1xf32, #tpu.memory_space<vmem>>, %arg4: memref<8x512xf32, #tpu.memory_space<vmem>>) attributes {dimension_semantics = [], scalar_prefetch = 0 : i64, scratch_operands = 0 : i64, tpu.core_type = #tpu.core_type<tc>} {
    %c0 = arith.constant 0 : index
    %c0_0 = arith.constant 0 : index
    %0 = vector.load %arg0[%c0, %c0_0] : memref<8x36xbf16, #tpu.memory_space<vmem>>, vector<8x36xbf16>
    %c0_1 = arith.constant 0 : index
    %c0_2 = arith.constant 0 : index
    %1 = vector.load %arg1[%c0_1, %c0_2] : memref<36x512xbf16, #tpu.memory_space<vmem>>, vector<36x512xbf16>
    %cst = arith.constant dense<0.000000e+00> : vector<8x512xf32>
    %2 = tpu.matmul %0, %1, %cst {dimension_numbers = #tpu.dot_dimension_numbers<[1], [0], [0], [1], [0, 0, 1, 1], [], []>} : vector<8x36xbf16>, vector<36x512xbf16>, vector<8x512xf32> -> vector<8x512xf32>
    %cst_3 = arith.constant dense<0.000000e+00> : vector<8xf32>
    %3 = vector.multi_reduction <add>, %2, %cst_3 [1] : vector<8x512xf32> to vector<8xf32>
    %4 = vector.shape_cast %3 : vector<8xf32> to vector<8x1xf32>
    %5 = arith.mulf %2, %2 : vector<8x512xf32>
    %cst_4 = arith.constant dense<0.000000e+00> : vector<8xf32>
    %6 = vector.multi_reduction <add>, %5, %cst_4 [1] : vector<8x512xf32> to vector<8xf32>
    %7 = vector.shape_cast %6 : vector<8xf32> to vector<8x1xf32>
    %cst_5 = arith.constant 0.001953125 : f32
    %8 = vector.broadcast %cst_5 : f32 to vector<8x1xf32>
    %9 = arith.mulf %4, %8 : vector<8x1xf32>
    %cst_6 = arith.constant 0.001953125 : f32
    %10 = vector.broadcast %cst_6 : f32 to vector<8x1xf32>
    %11 = arith.mulf %7, %10 : vector<8x1xf32>
    %12 = arith.mulf %9, %9 : vector<8x1xf32>
    %13 = arith.subf %11, %12 : vector<8x1xf32>
    %c0_7 = arith.constant 0 : index
    %c0_8 = arith.constant 0 : index
    %14 = vector.load %arg2[%c0_7, %c0_8] : memref<8x1xf32, #tpu.memory_space<vmem>>, vector<8x1xf32>
    %cst_9 = arith.constant 9.99999974E-6 : f32
    %15 = vector.broadcast %cst_9 : f32 to vector<8x1xf32>
    %16 = arith.addf %13, %15 : vector<8x1xf32>
    %17 = math.rsqrt %16 : vector<8x1xf32>
    %18 = arith.mulf %14, %17 : vector<8x1xf32>
    %c0_10 = arith.constant 0 : index
    %c0_11 = arith.constant 0 : index
    %19 = vector.load %arg3[%c0_10, %c0_11] : memref<8x1xf32, #tpu.memory_space<vmem>>, vector<8x1xf32>
    %20 = arith.mulf %9, %18 : vector<8x1xf32>
    %21 = arith.subf %19, %20 : vector<8x1xf32>
    %22 = vector.broadcast %18 : vector<8x1xf32> to vector<8x512xf32>
    %23 = arith.mulf %2, %22 : vector<8x512xf32>
    %24 = vector.broadcast %21 : vector<8x1xf32> to vector<8x512xf32>
    %25 = arith.addf %23, %24 : vector<8x512xf32>
    %c0_12 = arith.constant 0 : index
    %c0_13 = arith.constant 0 : index
    %26 = vector.load %arg4[%c0_12, %c0_13] : memref<8x512xf32, #tpu.memory_space<vmem>>, vector<8x512xf32>
    tpu.vector_store %arg4[%c0_12, %c0_13], %25 {strides = array<i32>} : memref<8x512xf32, #tpu.memory_space<vmem>>, vector<8x512xf32>,
    return
  }
}

</mosaic_0001>

<bundles_post_ra>
// kernel: tpu_custom_call.1
= control target key start
LH: loop header
LB: loop body
LE: loop exit
PB: predicated region body
PF: predicated region fallthrough
CT: control target
= control target key end

     0   :  { %9 = vsyncpa [#allocation3], 0  ;;  %s392_s0 = inlined_call_operand.vmem [shape: bf16[8,36], index: 0, kind: input, shape index: {}]   ;;  %s393_s1 = inlined_call_operand.hbm [shape: bf16[36,512], index: 1, kind: input, shape index: {}]   ;;  %s394_s2 = inlined_call_operand.vmem [shape: f32[8,1], index: 2, kind: input, shape index: {}]   ;;  %s395_s3 = inlined_call_operand.vmem [shape: f32[8,1], index: 3, kind: input, shape index: {}]   ;;  %s396_s4 = inlined_call_operand.hbm [shape: f32[8,512], index: 4, kind: output, shape index: {}]  }
   0x1   :  { %10 = vsyncpa [#allocation4], 0  ;;  %s17_s17 = sshll.u32 %s393_s1, 4  ;;  %s343_s18 = smov [#allocation2]   ;;  %s18_s17 = int_to_ptr.hbm [resolvable:$true] %s17_s17 }
   0x2   :  { %s19_s19 = sshll.u32 %s343_s18, 4  ;;  %s344_s20 = smov 256   ;;  %s20_s19 = int_to_ptr.vmem [resolvable:$true] %s19_s19 }
   0x3   :  { %s345_s21 = smov 16  }
   0x4   :  { %25 = dma.hbm_to_vmem [thread:$0]  %s18_s17, 1280, %s20_s19, [#allocation3], %s344_s20, %s344_s20, %s345_s21  }
   0x5   :  { %339 = dma.done.wait [#allocation3], 1280  }
   0x6   :  { %340 = vsyncadd [#allocation3], 4294966016  ;;  %v44_v0 = vld [vmem:[#allocation2 + $0x40] sm:$0x33]  ;;  %v45_v1 = vld [vmem:[#allocation2 + $0x48] sm:$0x33] }
   0x7   :  { %v72_v2 = vunpack.c.l.b16 %v44_v0  ;;  %v73_v3 = vunpack.c.h.b16 %v44_v0  ;;  %v74_v4 = vunpack.c.l.b16 %v45_v1  ;;  %v75_v5 = vunpack.c.h.b16 %v45_v1  ;;  %v256_v6 = vld [vmem:[#allocation2 + $0x20] sm:$0xf]  ;;  %v280_v7 = vld [vmem:[#allocation2 + $0x2c] sm:$0xf0]  ;;  %v278_v12 = vld [vmem:[#allocation2 + $0x24] sm:$0xf] }
   0x8   :  { %vm100_vm0 = vcmask 1041408   ;;  %v258_v13 = vld [vmem:[#allocation2 + $0x30] sm:$0xf0]  ;;  %v264_v14 = vld [vmem:[#allocation2 + $0x28] sm:$0xf]  ;;  %v257_v22 = vor.u32 %v280_v7, %v256_v6  ;;  %vm96_vm1 = vcmask 293888  }
   0x9   :  { %v84_v8 = vpack.c.b16 %v72_v2, %v72_v2  ;;  %v85_v9 = vpack.c.b16 %v73_v3, %v73_v3  ;;  %v86_v10 = vpack.c.b16 %v74_v4, %v74_v4  ;;  %v87_v11 = vpack.c.b16 %v75_v5, %v75_v5  ;;  %v281_v15 = vld [vmem:[#allocation2 + $0x34] sm:$0xf0]  ;;  %v279_v16 = vld [vmem:[#allocation2 + $0x2c] sm:$0xf]  ;;  %v266_v17 = vld [vmem:[#allocation2 + $0x38] sm:$0xf0] }
   0xa   :  { %v261_v23 = vor.u32 %v278_v12, %v258_v13  ;;  %v240_v24 = vld [vmem:[#allocation2] sm:$0xf]  ;;  %v276_v25 = vld [vmem:[#allocation2 + $0xc] sm:$0xf0]  ;;  %v265_v26 = vor.u32 %v281_v15, %v264_v14  ;;  %v269_v27 = vor.u32 %v279_v16, %v266_v17  ;;  %v274_v28 = vld [vmem:[#allocation2 + $0x4] sm:$0xf] }
   0xb   :  { %v102_v18 = vsel %vm100_vm0, %v84_v8, 0  ;;  %v105_v19 = vsel %vm100_vm0, %v85_v9, 0  ;;  %v108_v20 = vsel %vm100_vm0, %v86_v10, 0  ;;  %v111_v21 = vsel %vm100_vm0, %v87_v11, 0  ;;  %v242_v29 = vld [vmem:[#allocation2 + $0x10] sm:$0xf0] }
   0xc   :  { %118 = vmatpush.bf16.msra.mxu0 %v102_v18  ;;  %131 = vmatpush.bf16.msra.mxu1 %v105_v19  ;;  %v248_v30 = vld [vmem:[#allocation2 + $0x8] sm:$0xf]  ;;  %v277_v31 = vld [vmem:[#allocation2 + $0x14] sm:$0xf0]  ;;  %v275_v32 = vld [vmem:[#allocation2 + $0xc] sm:$0xf]  ;;  %v241_v34 = vor.u32 %v276_v25, %v240_v24  ;;  %v245_v35 = vor.u32 %v274_v28, %v242_v29 }
   0xd   :  { %144 = vmatpush.bf16.msra.mxu2 %v108_v20  ;;  %157 = vmatpush.bf16.msra.mxu3 %v111_v21  ;;  %v250_v33 = vld [vmem:[#allocation2 + $0x18] sm:$0xf0]  ;;  %v249_v36 = vor.u32 %v277_v31, %v248_v30  ;;  %v35_v38 = vld [vmem:[%s392_s0] sm:$0xf]  ;;  %v346_v57 = vmov 0   ;;  %s228_s29 = sshll.u32 %s396_s4, 4  ;;  %s229_s29 = int_to_ptr.hbm [resolvable:$true] %s228_s29 }
   0xe   :  { %v253_v37 = vor.u32 %v275_v32, %v250_v33  ;;  %287 = vset.pattern.permute.xlu1 %v346_v57  ;;  %288 = vset.pattern.permute.xlu0 %v346_v57  ;;  %v183_v6 = vld [vmem:[%s394_s2] sm:$0xff]  ;;  %s347_s2 = smov [#allocation5]  }
   0xf   :  { %v196_v11 = vld [vmem:[%s395_s3] sm:$0xff]  ;;  %s226_s26 = sshll.u32 %s347_s2, 4  ;;  %s227_s26 = int_to_ptr.vmem [resolvable:$true] %s226_s26 }
  0x10   :  { %119 = vmatpush.bf16.msra.mxu0 %v257_v22  ;;  %132 = vmatpush.bf16.msra.mxu1 %v261_v23 }
  0x11   :  { %145 = vmatpush.bf16.msra.mxu2 %v265_v26  ;;  %158 = vmatpush.bf16.msra.mxu3 %v269_v27 }
  0x14   :  { %120 = vmatpush.bf16.msra.mxu0 %v241_v34  ;;  %133 = vmatpush.bf16.msra.mxu1 %v245_v35 }
  0x15   :  { %146 = vmatpush.bf16.msra.mxu2 %v249_v36  ;;  %159 = vmatpush.bf16.msra.mxu3 %v253_v37 }
  0x17   :  { %270 = vmatmul.msk.bf16.vlgmr.msra.gmra.mxu0 %vm96_vm1, %v35_v38  ;;  %271 = vmatmul.msk.bf16.vlgmr.msra.gmra.mxu1 %vm96_vm1, %v35_v38 }
  0x18   :  { %272 = vmatmul.msk.bf16.vlgmr.msra.gmra.mxu2 %vm96_vm1, %v35_v38  ;;  %273 = vmatmul.msk.bf16.vlgmr.msra.gmra.mxu3 %vm96_vm1, %v35_v38 }
  0x94   :  { %v122_v39 = vpop.f32.mrf.mxu0  ;;  %v135_v40 = vpop.f32.mrf.mxu1 }
  0x95   :  { %v165_v41 = vadd.f32 %v135_v40, %v122_v39  ;;  %v170_v42 = vmul.f32 %v122_v39, %v122_v39  ;;  %v171_v43 = vmul.f32 %v135_v40, %v135_v40 }
  0x97   :  { %v174_v51 = vadd.f32 %v171_v43, %v170_v42 }
  0x9b   :  { %v148_v44 = vpop.f32.mrf.mxu2  ;;  %v161_v45 = vpop.f32.mrf.mxu3 }
  0x9c   :  { %v124_v46 = vpop.f32.mrf.mxu0  ;;  %v137_v47 = vpop.f32.mrf.mxu1  ;;  %v166_v48 = vadd.f32 %v165_v41, %v148_v44  ;;  %v172_v49 = vmul.f32 %v148_v44, %v148_v44  ;;  %v173_v52 = vmul.f32 %v161_v45, %v161_v45 }
  0x9e   :  { %v167_v50 = vadd.f32 %v166_v48, %v161_v45  ;;  %v175_v53 = vadd.f32 %v174_v51, %v172_v49 }
  0xa0   :  { %168 = vadd.xlane.f32.xlu0 %v167_v50  ;;  %v176_v56 = vadd.f32 %v175_v53, %v173_v52 }
  0xa3   :  { %v150_v54 = vpop.f32.mrf.mxu2  ;;  %v163_v55 = vpop.f32.mrf.mxu3 }
  0xa8   :  { %177 = vadd.xlane.f32.xlu0 %v176_v56 }
 0x113   :  { %v169_v58 = vpop.xlane.xlu0 %168 }
 0x114   :  { %v179_v59 = vmul.f32 0.001953125, %v169_v58 }
 0x116   :  { %v181_v61 = vmul.f32 %v179_v59, %v179_v59 }
 0x11b   :  { %v178_v60 = vpop.xlane.xlu0 %177 }
 0x11c   :  { %v180_v62 = vmul.f32 0.001953125, %v178_v60 }
 0x11e   :  { %v182_v63 = vsub.f32 %v180_v62, %v181_v61 }
 0x120   :  { %v184_v0 = vadd.f32 1e-05, %v182_v63 }
 0x122   :  { %289 = vrsqrt.f32 %v184_v0  ;;  %vm191_vm3 = vweird.f32 %v184_v0 }
 0x128   :  { %v290_v1 = vpop.eup %289 }
 0x129   :  { %v186_v2 = vmul.f32 %v290_v1, %v184_v0  ;;  %vm192_vm2 = vweird.f32 %v290_v1 }
 0x12a   :  { %vm193_vm4 = vmor %vm191_vm3, %vm192_vm2 }
 0x12b   :  { %v187_v3 = vmul.f32 %v290_v1, %v186_v2 }
 0x12d   :  { %v188_v4 = vmul.f32 0.5, %v187_v3 }
 0x12f   :  { %v189_v5 = vsub.f32 1.5, %v188_v4 }
 0x131   :  { %v190_v7 = vmul.f32 %v290_v1, %v189_v5 }
 0x133   :  { %v194_v8 = vsel %vm193_vm4, %v290_v1, %v190_v7 }
 0x134   :  { %v195_v9 = vmul.f32 %v194_v8, %v183_v6 }
 0x136   :  { %201 = vperm.xlu1 %287, %v195_v9   ;;  %v197_v10 = vmul.f32 %v195_v9, %v179_v59 }
 0x138   :  { %v198_v12 = vsub.f32 %v196_v11, %v197_v10 }
 0x13e   :  { %210 = vperm.xlu1 %287, %v198_v12  }
 0x1a8   :  { %v202_v13 = vpop.permute.xlu1 %201 }
 0x1a9   :  { %v204_v14 = vmul.f32 %v202_v13, %v122_v39  ;;  %v205_v15 = vmul.f32 %v202_v13, %v135_v40  ;;  %v206_v16 = vmul.f32 %v202_v13, %v148_v44  ;;  %v207_v17 = vmul.f32 %v202_v13, %v161_v45 }
 0x1b0   :  { %v211_v18 = vpop.permute.xlu1 %210 }
 0x1b1   :  { %v213_v19 = vadd.f32 %v211_v18, %v204_v14  ;;  %v214_v20 = vadd.f32 %v211_v18, %v205_v15  ;;  %v215_v21 = vadd.f32 %v211_v18, %v206_v16  ;;  %v216_v22 = vadd.f32 %v211_v18, %v207_v17 }
 0x1b3   :  { %217 = vst [vmem:[#allocation5] sm:$0xff] %v213_v19 }
 0x1b4   :  { %218 = vst [vmem:[#allocation5 + $0x8] sm:$0xff] %v214_v20 }
 0x1b5   :  { %219 = vst [vmem:[#allocation5 + $0x10] sm:$0xff] %v215_v21 }
 0x1b6   :  { %220 = vst [vmem:[#allocation5 + $0x18] sm:$0xff] %v216_v22 }
 0x1b7   :  { %231 = dma.vmem_to_hbm [thread:$0]  %s227_s26, 512, %s229_s29, [#allocation4]  }
 0x1b8   :  { %341 = dma.done.wait [#allocation4], 512  }
 0x1b9   :  { %342 = vsyncadd [#allocation4], 4294966784 }
 0x1ba   :  { %236 = vsyncpa [#allocation3], 1 }
 0x1bb   :  { %237 = vsyncpa [#allocation4], 1 }

</bundles_post_ra>
